<compile_context>
chip_gen: v5e
topology: v5e:2x2
jax: 0.10.0
libtpu: 0.0.40
codegen_flags: <defaults>
</compile_context>

<pallas_src>
import functools
import math

import jax
import jax.numpy as jnp
from jax.experimental import pallas as pl
from jax.experimental.pallas import tpu as pltpu

LN_EPS = 1e-7                                    # DeBERTa layer_norm_eps
NEG_INF = float(jnp.finfo(jnp.float32).min)      # XSoftmax uses finfo(dtype).min


# ----------------------------- helpers -----------------------------------

def _layer_norm(x, gamma, beta, eps):
    # x: (R, H) f32; gamma/beta: (1, H); biased variance like torch.nn.LayerNorm.
    mu = jnp.mean(x, axis=-1, keepdims=True)
    var = jnp.mean((x - mu) ** 2, axis=-1, keepdims=True)
    return (x - mu) * jax.lax.rsqrt(var + eps) * gamma + beta


def _pick_group(n_seq, seq_len, target_rows=256):
    """Pack G sequences per grid step so G*seq_len is large (MXU M dim)."""
    g = 1
    for cand in range(1, n_seq + 1):
        if n_seq % cand == 0 and cand * seq_len <= target_rows:
            g = cand
    return g


def _attention_bias(mask, group):
    """Additive bias (Nb, R, R): 0 where query & key are in the same sequence and
    the key is unmasked, finfo.min otherwise (block-diagonal + key-padding)."""
    N, S = mask.shape
    G = group
    Nb = N // G
    m = (mask.reshape(Nb, G, S) > 0).astype(jnp.float32)
    eye = jnp.eye(G, dtype=jnp.float32)
    keep = eye[None, :, None, :, None] * m[:, None, None, :, :]      # (Nb,G,1,G,S)
    keep = jnp.broadcast_to(keep, (Nb, G, S, G, S)).reshape(Nb, G * S, G * S)
    return jnp.where(keep > 0, 0.0, NEG_INF).astype(jnp.float32)


# -------------------- kernel 1: char-embedding LN + mask ------------------

def embed_ln_mask_kernel(x_ref, m_ref, g_ref, b_ref, o_ref, *, eps):
    x = x_ref[0].astype(jnp.float32)             # (R, H)
    y = _layer_norm(x, g_ref[...], b_ref[...], eps)
    o_ref[0] = (y * m_ref[0]).astype(o_ref.dtype)


def embed_ln_mask(x, mask, gamma, beta, group):
    # x: (N, C, H), mask: (N, C); packed into (Nb, R=group*C, H) row-blocks.
    N, C, H = x.shape
    Nb, R = N // group, group * C
    xp = x.reshape(Nb, R, H)
    mp = (mask.reshape(Nb, R, 1) > 0).astype(jnp.float32)
    out = pl.pallas_call(
        functools.partial(embed_ln_mask_kernel, eps=LN_EPS),
        out_shape=jax.ShapeDtypeStruct((Nb, R, H), jnp.float32),
        grid=(Nb,),
        in_specs=[
            pl.BlockSpec((1, R, H), lambda i: (i, 0, 0)),
            pl.BlockSpec((1, R, 1), lambda i: (i, 0, 0)),
            pl.BlockSpec((1, H), lambda i: (0, 0)),
            pl.BlockSpec((1, H), lambda i: (0, 0)),
        ],
        out_specs=pl.BlockSpec((1, R, H), lambda i: (i, 0, 0)),
        compiler_params=pltpu.CompilerParams(dimension_semantics=("parallel",)),
    )(xp, mp, gamma, beta)
    return out.reshape(N, C, H)


# ---------------- kernel 2: fused multi-layer BERT encoder ----------------

def encoder_stack_kernel(x_ref, bias_ref, qm_ref,
                         wqkv_ref, bqkv_ref, wo_ref, bo_ref, g1_ref, b1_ref,
                         wi_ref, bi_ref, wd_ref, bd_ref, g2_ref, b2_ref,
                         o_ref, h_ref, *, num_heads, eps, collect_all):
    l = pl.program_id(1)

    # Load the input activation once (layer 0); afterwards it stays in VMEM scratch.
    @pl.when(l == 0)
    def _():
        h_ref[...] = x_ref[0].astype(jnp.float32)

    x = h_ref[...]                               # (R, H) f32 — current layer input
    R, H = x.shape
    dh = H // num_heads
    scale = 1.0 / math.sqrt(dh)

    # ---- fused QKV projection: one bf16 MXU matmul, f32 accumulate ----
    qkv = (jnp.dot(x.astype(jnp.bfloat16), wqkv_ref[0],
                   preferred_element_type=jnp.float32) + bqkv_ref[0])   # (R, 3H)
    q = qkv[:, :H] * scale
    k = qkv[:, H:2 * H]
    v = qkv[:, 2 * H:]

    # ---- head-batched attention: (heads, R, dh) -> batched MXU matmuls ----
    qh = jnp.stack([q[:, h * dh:(h + 1) * dh] for h in range(num_heads)],
                   0).astype(jnp.bfloat16)
    kh = jnp.stack([k[:, h * dh:(h + 1) * dh] for h in range(num_heads)],
                   0).astype(jnp.bfloat16)
    vh = jnp.stack([v[:, h * dh:(h + 1) * dh] for h in range(num_heads)],
                   0).astype(jnp.bfloat16)

    s = jnp.einsum('hqd,hkd->hqk', qh, kh, preferred_element_type=jnp.float32)
    s = s + bias_ref[0][None, :, :]              # additive mask (keys + block-diag)
    s = s - jnp.max(s, axis=-1, keepdims=True)
    p = jnp.exp(s)
    p = p * pl.reciprocal(jnp.sum(p, axis=-1, keepdims=True), approx=True)

    ctx = jnp.einsum('hqk,hkd->hqd', p.astype(jnp.bfloat16), vh,
                     preferred_element_type=jnp.float32)                # (nh, R, dh)
    ctx = jnp.concatenate([ctx[h] for h in range(num_heads)], axis=-1)  # (R, H)
    ctx = ctx * qm_ref[0]                        # XSoftmax: zero masked query rows

    attn = jnp.dot(ctx.astype(jnp.bfloat16), wo_ref[0],
                   preferred_element_type=jnp.float32) + bo_ref[0]
    h1 = _layer_norm(attn + x, g1_ref[0], b1_ref[0], eps)

    inter = jax.nn.gelu(jnp.dot(h1.astype(jnp.bfloat16), wi_ref[0],
                                preferred_element_type=jnp.float32) + bi_ref[0])
    ffn = jnp.dot(inter.astype(jnp.bfloat16), wd_ref[0],
                  preferred_element_type=jnp.float32) + bd_ref[0]
    h2 = _layer_norm(ffn + h1, g2_ref[0], b2_ref[0], eps)

    h_ref[...] = h2                              # carry to next layer (VMEM resident)

    if collect_all:
        # Every layer's output goes to its own HBM block.
        o_ref[0, 0] = h2.astype(o_ref.dtype)
    else:
        # Only the last layer is needed: skip the cast + VMEM store on earlier
        # layers (output block index is constant across l, so writeback to HBM
        # happens exactly once per row-block anyway).
        @pl.when(l == pl.num_programs(1) - 1)
        def _():
            o_ref[0, 0] = h2.astype(o_ref.dtype)


def encoder_stack(x, mask, stacked, num_heads, *, collect_all):
    """Run all layers of one BertEncoder in a single pallas_call.

    x: (N, S, H) activations, mask: (N, S).  Returns a list of per-layer outputs
    (all layers if collect_all else only the last), each (N, S, H).
    """
    N, S, H = x.shape
    G = _pick_group(N, S)
    Nb, R = N // G, G * S
    L = stacked['w_qkv'].shape[0]
    Lout = L if collect_all else 1
    inter_dim = stacked['wi'].shape[-1]

    xp = x.reshape(Nb, R, H).astype(jnp.float32)
    bias = _attention_bias(mask, G)                                   # (Nb, R, R)
    qm = (mask.reshape(Nb, R, 1) > 0).astype(jnp.float32)             # query mask

    w_names = ('w_qkv', 'b_qkv', 'wo', 'bo', 'ln1_g', 'ln1_b',
               'wi', 'bi', 'wd', 'bd', 'ln2_g', 'ln2_b')
    weights = [stacked[n] for n in w_names]
    w_specs = [pl.BlockSpec((1,) + w.shape[1:],
                            lambda i, l, _nd=w.ndim - 1: (l,) + (0,) * _nd)
               for w in weights]

    # --- explicit VMEM budget (double-buffered blocks + scratch + intermediates) ---
    in_blocks = [((1, R, H), xp), ((1, R, R), bias), ((1, R, 1), qm)] + \
                [((1,) + w.shape[1:], w) for w in weights]
    in_bytes = sum(math.prod(b) * a.dtype.itemsize for b, a in in_blocks)
    out_bytes = R * H * 4
    work_bytes = 4 * (R * 3 * H + 2 * num_heads * R * R + R * inter_dim + 6 * R * H)
    est = 2 * (in_bytes + out_bytes) + R * H * 4 + work_bytes
    vmem_limit = int(min(64 * 1024 * 1024, max(2 * est, 16 * 1024 * 1024)))

    if collect_all:
        out_spec = pl.BlockSpec((1, 1, R, H), lambda i, l: (i, l, 0, 0))
    else:
        out_spec = pl.BlockSpec((1, 1, R, H), lambda i, l: (i, 0, 0, 0))

    out = pl.pallas_call(
        functools.partial(encoder_stack_kernel, num_heads=num_heads, eps=LN_EPS,
                          collect_all=collect_all),
        out_shape=jax.ShapeDtypeStruct((Nb, Lout, R, H), jnp.float32),
        grid=(Nb, L),
        in_specs=[pl.BlockSpec((1, R, H), lambda i, l: (i, 0, 0)),
                  pl.BlockSpec((1, R, R), lambda i, l: (i, 0, 0)),
                  pl.BlockSpec((1, R, 1), lambda i, l: (i, 0, 0))] + w_specs,
        out_specs=out_spec,
        scratch_shapes=[pltpu.VMEM((R, H), jnp.float32)],
        compiler_params=pltpu.CompilerParams(
            dimension_semantics=("parallel", "arbitrary"),
            vmem_limit_bytes=vmem_limit),
    )(xp, bias, qm, *weights)

    out = out.reshape(Nb, Lout, G, S, H)
    return [out[:, j].reshape(N, S, H) for j in range(Lout)]


# ----------------------- parameters (synthetic init) ----------------------

def _stack_layers(layers):
    """Stack per-layer params with a leading L axis; matmul weights in bf16."""
    bf16 = jnp.bfloat16

    def stk(fn, dtype=None):
        a = jnp.stack([fn(lp) for lp in layers], axis=0)
        return a.astype(dtype) if dtype is not None else a

    return dict(
        w_qkv=stk(lambda lp: jnp.concatenate([lp['wq'], lp['wk'], lp['wv']], 1), bf16),
        b_qkv=stk(lambda lp: jnp.concatenate([lp['bq'], lp['bk'], lp['bv']], 1)),
        wo=stk(lambda lp: lp['wo'], bf16), bo=stk(lambda lp: lp['bo']),
        ln1_g=stk(lambda lp: lp['ln1_g']), ln1_b=stk(lambda lp: lp['ln1_b']),
        wi=stk(lambda lp: lp['wi'], bf16), bi=stk(lambda lp: lp['bi']),
        wd=stk(lambda lp: lp['wd'], bf16), bd=stk(lambda lp: lp['bd']),
        ln2_g=stk(lambda lp: lp['ln2_g']), ln2_b=stk(lambda lp: lp['ln2_b']),
    )


def init_params(key, vocab_size, hidden, intermediate, n_intra, n_inter):
    def dense(k, fi, fo):
        k1, k2 = jax.random.split(k)
        return (jax.random.normal(k1, (fi, fo), jnp.float32) * 0.02,
                jax.random.normal(k2, (1, fo), jnp.float32) * 0.02)

    def layer(k):
        ks = jax.random.split(k, 6)
        wq, bq = dense(ks[0], hidden, hidden)
        wk, bk = dense(ks[1], hidden, hidden)
        wv, bv = dense(ks[2], hidden, hidden)
        wo, bo = dense(ks[3], hidden, hidden)
        wi, bi = dense(ks[4], hidden, intermediate)
        wd, bd = dense(ks[5], intermediate, hidden)
        return dict(wq=wq, bq=bq, wk=wk, bk=bk, wv=wv, bv=bv, wo=wo, bo=bo,
                    ln1_g=jnp.ones((1, hidden), jnp.float32),
                    ln1_b=jnp.zeros((1, hidden), jnp.float32),
                    wi=wi, bi=bi, wd=wd, bd=bd,
                    ln2_g=jnp.ones((1, hidden), jnp.float32),
                    ln2_b=jnp.zeros((1, hidden), jnp.float32))

    keys = jax.random.split(key, 1 + n_intra + n_inter)
    emb = jax.random.normal(keys[0], (vocab_size, hidden), jnp.float32) * 0.02
    emb = emb.at[0].set(0.0)  # padding_idx=0
    intra = [layer(keys[1 + i]) for i in range(n_intra)]
    inter = [layer(keys[1 + n_intra + i]) for i in range(n_inter)]
    return dict(char_emb=emb,
                emb_ln_g=jnp.ones((1, hidden), jnp.float32),
                emb_ln_b=jnp.zeros((1, hidden), jnp.float32),
                intra_stack=_stack_layers(intra),
                inter_stack=_stack_layers(inter))


# ----------------------------- forward ------------------------------------

def char_to_word_deberta_forward(params, input_ids, char_input_mask, word_input_mask,
                                 num_heads=4, output_all_encoded_layers=True):
    B, W, C = input_ids.shape
    H = params['char_emb'].shape[1]

    # Embedding gather stays in JAX (glue); everything downstream is Pallas.
    emb = jnp.take(params['char_emb'], input_ids, axis=0).reshape(B * W, C, H)
    intra_word_mask = char_input_mask.reshape(B * W, C)

    g_intra = _pick_group(B * W, C)
    char_embeds = embed_ln_mask(emb, intra_word_mask,
                                params['emb_ln_g'], params['emb_ln_b'], g_intra)
    # TODO(synk): StableDropout has no inference-time effect; intentionally identity.

    intra_out = encoder_stack(char_embeds, intra_word_mask, params['intra_stack'],
                              num_heads, collect_all=False)
    initial_embeds = intra_out[-1]                     # (B*W, C, H)
    initial_word_embeds = initial_embeds[:, 0, :]      # first char per word
    word_embeds_in = initial_word_embeds.reshape(B, W, H)

    hidden_states = encoder_stack(word_embeds_in, word_input_mask,
                                  params['inter_stack'], num_heads,
                                  collect_all=output_all_encoded_layers)
    word_embeds = hidden_states[-1]

    return {
        'word_embeds': word_embeds,
        'initial_embeds': initial_embeds,
        'initial_word_embeds': initial_word_embeds,
        'intra_word_mask': intra_word_mask,
        'char_embeds': char_embeds,
        'input_shape': (B, W, C, H),
        'hidden_states': hidden_states,
    }


# ------------------------------- main --------------------------------------

if __name__ == "__main__":
    key = jax.random.PRNGKey(0)
    B, W, C, H, HEADS, INTER = 2, 4, 8, 32, 4, 64
    VOCAB = 50

    kp, kid = jax.random.split(key)
    params = init_params(kp, VOCAB, H, INTER, n_intra=2, n_inter=2)

    ids = jax.random.randint(kid, (B, W, C), 1, VOCAB, dtype=jnp.int32)
    char_pos = jnp.arange(C)[None, None, :]
    char_lens = jnp.minimum(2 + jnp.arange(W), C)[None, :, None]
    char_input_mask = ((char_pos < char_lens).astype(jnp.int32)
                       * jnp.ones((B, 1, 1), jnp.int32))              # (B, W, C)
    ids = ids * char_input_mask                                        # padded -> id 0
    word_input_mask = jnp.ones((B, W), jnp.int32).at[1, W - 1].set(0)

    out = char_to_word_deberta_forward(params, ids, char_input_mask, word_input_mask,
                                       num_heads=HEADS)
    jax.block_until_ready(out['word_embeds'])
    jax.block_until_ready(out['initial_embeds'])
    jax.block_until_ready(out['char_embeds'])
    print("KERNEL_OK")
</pallas_src>

<mosaic_0001>
module attributes {stable_mosaic.version = 11 : i64} {
  func.func @embed_ln_mask_kernel(%arg0: i32, %arg1: memref<1x64x32xf32, #tpu.memory_space<vmem>>, %arg2: memref<1x64x1xf32, #tpu.memory_space<vmem>>, %arg3: memref<1x32xf32, #tpu.memory_space<vmem>>, %arg4: memref<1x32xf32, #tpu.memory_space<vmem>>, %arg5: memref<1x64x32xf32, #tpu.memory_space<vmem>>) attributes {dimension_semantics = [#tpu.dimension_semantics<parallel>], iteration_bounds = array<i64: 1>, scalar_prefetch = 0 : i64, scratch_operands = 0 : i64, tpu.core_type = #tpu.core_type<tc>, window_params = [{transform_indices = @transform_0, window_bounds = array<i64: 1, 64, 32>}, {transform_indices = @transform_1, window_bounds = array<i64: 1, 64, 1>}, {pipeline_mode = #tpu.pipeline_mode<synchronous>, transform_indices = @transform_2, window_bounds = array<i64: 1, 32>}, {pipeline_mode = #tpu.pipeline_mode<synchronous>, transform_indices = @transform_3, window_bounds = array<i64: 1, 32>}, {transform_indices = @transform_4, window_bounds = array<i64: 1, 64, 32>}]} {
    %c0 = arith.constant 0 : index
    %c0_0 = arith.constant 0 : index
    %c0_1 = arith.constant 0 : index
    %0 = vector.load %arg1[%c0, %c0_0, %c0_1] : memref<1x64x32xf32, #tpu.memory_space<vmem>>, vector<1x64x32xf32>
    %1 = vector.shape_cast %0 : vector<1x64x32xf32> to vector<64x32xf32>
    %c0_2 = arith.constant 0 : index
    %c0_3 = arith.constant 0 : index
    %2 = vector.load %arg3[%c0_2, %c0_3] : memref<1x32xf32, #tpu.memory_space<vmem>>, vector<1x32xf32>
    %c0_4 = arith.constant 0 : index
    %c0_5 = arith.constant 0 : index
    %3 = vector.load %arg4[%c0_4, %c0_5] : memref<1x32xf32, #tpu.memory_space<vmem>>, vector<1x32xf32>
    %cst = arith.constant dense<0.000000e+00> : vector<64xf32>
    %4 = vector.multi_reduction <add>, %1, %cst [1] : vector<64x32xf32> to vector<64xf32>
    %5 = vector.shape_cast %4 : vector<64xf32> to vector<64x1xf32>
    %cst_6 = arith.constant 3.200000e+01 : f32
    %6 = vector.broadcast %cst_6 : f32 to vector<64x1xf32>
    %7 = arith.divf %5, %6 : vector<64x1xf32>
    %8 = vector.broadcast %7 : vector<64x1xf32> to vector<64x32xf32>
    %9 = arith.subf %1, %8 : vector<64x32xf32>
    %10 = arith.mulf %9, %9 : vector<64x32xf32>
    %cst_7 = arith.constant dense<0.000000e+00> : vector<64xf32>
    %11 = vector.multi_reduction <add>, %10, %cst_7 [1] : vector<64x32xf32> to vector<64xf32>
    %12 = vector.shape_cast %11 : vector<64xf32> to vector<64x1xf32>
    %cst_8 = arith.constant 3.200000e+01 : f32
    %13 = vector.broadcast %cst_8 : f32 to vector<64x1xf32>
    %14 = arith.divf %12, %13 : vector<64x1xf32>
    %15 = vector.broadcast %7 : vector<64x1xf32> to vector<64x32xf32>
    %16 = arith.subf %1, %15 : vector<64x32xf32>
    %cst_9 = arith.constant 1.000000e-07 : f32
    %17 = vector.broadcast %cst_9 : f32 to vector<64x1xf32>
    %18 = arith.addf %14, %17 : vector<64x1xf32>
    %19 = math.rsqrt %18 : vector<64x1xf32>
    %20 = vector.broadcast %19 : vector<64x1xf32> to vector<64x32xf32>
    %21 = arith.mulf %16, %20 : vector<64x32xf32>
    %22 = vector.broadcast %2 : vector<1x32xf32> to vector<64x32xf32>
    %23 = arith.mulf %21, %22 : vector<64x32xf32>
    %24 = vector.broadcast %3 : vector<1x32xf32> to vector<64x32xf32>
    %25 = arith.addf %23, %24 : vector<64x32xf32>
    %c0_10 = arith.constant 0 : index
    %c0_11 = arith.constant 0 : index
    %c0_12 = arith.constant 0 : index
    %26 = vector.load %arg2[%c0_10, %c0_11, %c0_12] : memref<1x64x1xf32, #tpu.memory_space<vmem>>, vector<1x64x1xf32>
    %27 = vector.shape_cast %26 : vector<1x64x1xf32> to vector<64x1xf32>
    %28 = vector.broadcast %27 : vector<64x1xf32> to vector<64x32xf32>
    %29 = arith.mulf %25, %28 : vector<64x32xf32>
    %c0_13 = arith.constant 0 : index
    %c0_14 = arith.constant 0 : index
    %c0_15 = arith.constant 0 : index
    %30 = vector.load %arg5[%c0_13, %c0_14, %c0_15] : memref<1x64x32xf32, #tpu.memory_space<vmem>>, vector<1x64x32xf32>
    %31 = vector.shape_cast %30 : vector<1x64x32xf32> to vector<64x32xf32>
    %32 = vector.shape_cast %29 : vector<64x32xf32> to vector<1x64x32xf32>
    tpu.vector_store %arg5[%c0_13, %c0_14, %c0_15], %32 {strides = array<i32>} : memref<1x64x32xf32, #tpu.memory_space<vmem>>, vector<1x64x32xf32>,
    return
  }
  func.func @transform_0(%arg0: i32) -> (i32, i32, i32) {
    %c0_i32 = arith.constant 0 : i32
    %c0_i32_0 = arith.constant 0 : i32
    %c0_i32_1 = arith.constant 0 : i32
    return %arg0, %c0_i32, %c0_i32_0 : i32, i32, i32
  }
  func.func @transform_1(%arg0: i32) -> (i32, i32, i32) {
    %c0_i32 = arith.constant 0 : i32
    %c0_i32_0 = arith.constant 0 : i32
    %c0_i32_1 = arith.constant 0 : i32
    return %arg0, %c0_i32, %c0_i32_0 : i32, i32, i32
  }
  func.func @transform_2(%arg0: i32) -> (i32, i32) {
    %c0_i32 = arith.constant 0 : i32
    %c0_i32_0 = arith.constant 0 : i32
    %c0_i32_1 = arith.constant 0 : i32
    return %c0_i32, %c0_i32_0 : i32, i32
  }
  func.func @transform_3(%arg0: i32) -> (i32, i32) {
    %c0_i32 = arith.constant 0 : i32
    %c0_i32_0 = arith.constant 0 : i32
    %c0_i32_1 = arith.constant 0 : i32
    return %c0_i32, %c0_i32_0 : i32, i32
  }
  func.func @transform_4(%arg0: i32) -> (i32, i32, i32) {
    %c0_i32 = arith.constant 0 : i32
    %c0_i32_0 = arith.constant 0 : i32
    %c0_i32_1 = arith.constant 0 : i32
    return %arg0, %c0_i32, %c0_i32_0 : i32, i32, i32
  }
}

</mosaic_0001>

<bundles_post_ra>
// kernel: tpu_custom_call.1
= control target key start
LH: loop header
LB: loop body
LE: loop exit
PB: predicated region body
PF: predicated region fallthrough
CT: control target
= control target key end

     0   :  { %vm27_vm0 = vcmask 261120   ;;  %v326_v3 = vmov 0   ;;  %v327_v19 = vmov 32.0   ;;  %s618_s0 = inlined_call_operand.vmem [shape: f32[1,64,32], index: 0, kind: input, shape index: {}]   ;;  %s619_s1 = inlined_call_operand.vmem [shape: f32[1,64,1], index: 1, kind: input, shape index: {}]   ;;  %s620_s2 = inlined_call_operand.vmem [shape: f32[1,32], index: 2, kind: input, shape index: {}]   ;;  %s621_s3 = inlined_call_operand.vmem [shape: f32[1,32], index: 3, kind: input, shape index: {}]   ;;  %s622_s4 = inlined_call_operand.vmem [shape: f32[1,64,32], index: 4, kind: output, shape index: {}]  }
   0x1   :  { %v356_v0 = vld [vmem:[%s618_s0 + $0x20] sm:$0xff]  ;;  %v19_v1 = vld [vmem:[%s618_s0 + $0x10] sm:$0xff]  ;;  %303 = vset.pattern.permute.xlu1 %v326_v3  ;;  %304 = vset.pattern.permute.xlu2 %v326_v3  ;;  %v22_v7 = vld [vmem:[%s618_s0 + $0x28] sm:$0xff]  ;;  %308 = vrcp.f32 %v327_v19 }
   0x2   :  { %v17_v2 = vld [vmem:[%s618_s0] sm:$0xff]  ;;  %v40_v4 = vsel %vm27_vm0, %v356_v0, 0.0  ;;  %v34_v5 = vsel %vm27_vm0, %v19_v1, 0.0  ;;  %305 = vset.pattern.permute.xlu0 %v326_v3  ;;  %v20_v8 = vld [vmem:[%s618_s0 + $0x18] sm:$0xff]  ;;  %v18_v9 = vld [vmem:[%s618_s0 + $0x8] sm:$0xff]  ;;  %v43_v10 = vsel %vm27_vm0, %v22_v7, 0.0 }
   0x3   :  { %v28_v6 = vsel %vm27_vm0, %v17_v2, 0.0  ;;  %41 = vadd.xlane.f32.xlu2 %v40_v4  ;;  %35 = vadd.xlane.f32.xlu1 %v34_v5  ;;  %v37_v11 = vsel %vm27_vm0, %v20_v8, 0.0  ;;  %v31_v12 = vsel %vm27_vm0, %v18_v9, 0.0  ;;  %v24_v13 = vld [vmem:[%s618_s0 + $0x38] sm:$0xff]  ;;  %v23_v14 = vld [vmem:[%s618_s0 + $0x30] sm:$0xff]  ;;  %v234_v17 = vld [vmem:[%s619_s1 + $0x8] sm:$0xff] }
   0x4   :  { %29 = vadd.xlane.f32.xlu0 %v28_v6  ;;  %v49_v15 = vsel %vm27_vm0, %v24_v13, 0.0  ;;  %v46_v16 = vsel %vm27_vm0, %v23_v14, 0.0  ;;  %v233_v18 = vld [vmem:[%s619_s1] sm:$0xff]  ;;  %v236_v3 = vld [vmem:[%s619_s1 + $0x18] sm:$0xff]  ;;  %v239_v4 = vld [vmem:[%s619_s1 + $0x30] sm:$0xff] }
   0x5   :  { %v235_v5 = vld [vmem:[%s619_s1 + $0x10] sm:$0xff]  ;;  %v238_v6 = vld [vmem:[%s619_s1 + $0x28] sm:$0xff] }
   0x7   :  { %v309_v20 = vpop.eup %308 }
   0x8   :  { %v53_v21 = vmul.f32 32.0, %v309_v20  ;;  %vm57_vm1 = vweird.f32 %v309_v20 }
   0xa   :  { %v54_v22 = vsub.f32 1.0, %v53_v21 }
   0xb   :  { %44 = vadd.xlane.f32.xlu2 %v43_v10  ;;  %38 = vadd.xlane.f32.xlu1 %v37_v11 }
   0xc   :  { %32 = vadd.xlane.f32.xlu0 %v31_v12  ;;  %v55_v23 = vmul.f32 %v309_v20, %v54_v22 }
   0xe   :  { %v56_v24 = vadd.f32 %v309_v20, %v55_v23 }
  0x10   :  { %v394_v25 = vsel %vm57_vm1, %v309_v20, %v56_v24 }
  0x13   :  { %50 = vadd.xlane.f32.xlu1 %v49_v15 }
  0x14   :  { %47 = vadd.xlane.f32.xlu0 %v46_v16 }
  0x23   :  { %248 = vperm.xlu2 %304, %v234_v17  }
  0x2c   :  { %243 = vperm.xlu1 %303, %v233_v18  }
  0x76   :  { %v42_v26 = vpop.xlane.xlu2 %41  ;;  %v36_v27 = vpop.xlane.xlu1 %35 }
  0x77   :  { %v61_v28 = vmul.f32 %v394_v25, %v36_v27  ;;  %v30_v29 = vpop.xlane.xlu0 %29  ;;  %v63_v45 = vmul.f32 %v394_v25, %v42_v26 }
  0x78   :  { %v59_v30 = vmul.f32 %v394_v25, %v30_v29 }
  0x79   :  { %v398_v31 = vsub.f32 %v19_v1, %v61_v28  ;;  %v427_v52 = vsub.f32 %v356_v0, %v63_v45 }
  0x7a   :  { %v400_v32 = vsub.f32 %v17_v2, %v59_v30  ;;  %v237_v2 = vld [vmem:[%s619_s1 + $0x20] sm:$0xff] }
  0x7b   :  { %v77_v33 = vmul.f32 %v398_v31, %v398_v31  ;;  %v79_v59 = vmul.f32 %v427_v52, %v427_v52 }
  0x7c   :  { %v75_v34 = vmul.f32 %v400_v32, %v400_v32 }
  0x7d   :  { %v89_v35 = vsel %vm27_vm0, %v77_v33, 0.0  ;;  %v95_v62 = vsel %vm27_vm0, %v79_v59, 0.0 }
  0x7e   :  { %v45_v36 = vpop.xlane.xlu2 %44  ;;  %90 = vadd.xlane.f32.xlu1 %v89_v35  ;;  %v39_v37 = vpop.xlane.xlu1 %38  ;;  %v83_v38 = vsel %vm27_vm0, %v75_v34, 0.0 }
  0x7f   :  { %v64_v39 = vmul.f32 %v394_v25, %v45_v36  ;;  %v62_v40 = vmul.f32 %v394_v25, %v39_v37  ;;  %84 = vadd.xlane.f32.xlu2 %v83_v38  ;;  %v33_v41 = vpop.xlane.xlu0 %32 }
  0x80   :  { %v60_v42 = vmul.f32 %v394_v25, %v33_v41 }
  0x81   :  { %v411_v43 = vsub.f32 %v22_v7, %v64_v39  ;;  %v413_v44 = vsub.f32 %v20_v8, %v62_v40  ;;  %v240_v7 = vld [vmem:[%s619_s1 + $0x38] sm:$0xff] }
  0x82   :  { %v416_v46 = vsub.f32 %v18_v9, %v60_v42 }
  0x83   :  { %v80_v47 = vmul.f32 %v411_v43, %v411_v43  ;;  %v78_v48 = vmul.f32 %v413_v44, %v413_v44 }
  0x84   :  { %v76_v49 = vmul.f32 %v416_v46, %v416_v46 }
  0x85   :  { %v98_v50 = vsel %vm27_vm0, %v80_v47, 0.0  ;;  %v92_v51 = vsel %vm27_vm0, %v78_v48, 0.0 }
  0x86   :  { %99 = vadd.xlane.f32.xlu1 %v98_v50  ;;  %v86_v53 = vsel %vm27_vm0, %v76_v49, 0.0  ;;  %v51_v54 = vpop.xlane.xlu1 %50  ;;  %v465_v9 = vpop.permute.xlu2 %248 }
  0x87   :  { %93 = vadd.xlane.f32.xlu2 %v92_v51  ;;  %87 = vadd.xlane.f32.xlu0 %v86_v53  ;;  %v48_v55 = vpop.xlane.xlu0 %47  ;;  %v66_v57 = vmul.f32 %v394_v25, %v51_v54  ;;  %v504_v53 = vld [vmem:[%s620_s2] ss:$0 sm:$0xff] }
  0x88   :  { %v65_v56 = vmul.f32 %v394_v25, %v48_v55 }
  0x89   :  { %v436_v60 = vsub.f32 %v24_v13, %v66_v57 }
  0x8a   :  { %v432_v58 = vsub.f32 %v23_v14, %v65_v56 }
  0x8b   :  { %v82_v0 = vmul.f32 %v436_v60, %v436_v60 }
  0x8c   :  { %v81_v61 = vmul.f32 %v432_v58, %v432_v58 }
  0x8d   :  { %v104_v1 = vsel %vm27_vm0, %v82_v0, 0.0 }
  0x8e   :  { %v101_v63 = vsel %vm27_vm0, %v81_v61, 0.0  ;;  %v514_v61 = vld [vmem:[%s621_s3] ss:$0 sm:$0xff] }
  0x8f   :  { %96 = vadd.xlane.f32.xlu0 %v95_v62  ;;  %102 = vadd.xlane.f32.xlu2 %v101_v63 }
  0x97   :  { %105 = vadd.xlane.f32.xlu0 %v104_v1 }
  0x9e   :  { %v463_v8 = vpop.permute.xlu1 %243 }
  0x9f   :  { %263 = vperm.xlu1 %303, %v237_v2  }
  0xa7   :  { %258 = vperm.xlu2 %304, %v236_v3   ;;  %273 = vperm.xlu1 %303, %v239_v4  }
  0xab   :  { %253 = vperm.xlu0 %305, %v235_v5  }
  0xaf   :  { %268 = vperm.xlu2 %304, %v238_v6  }
  0xb7   :  { %278 = vperm.xlu2 %304, %v240_v7  }
  0xf1   :  { %v91_v10 = vpop.xlane.xlu1 %90 }
  0xf2   :  { %v109_v11 = vmul.f32 %v91_v10, %v394_v25  ;;  %v85_v12 = vpop.xlane.xlu2 %84 }
  0xf3   :  { %v107_v13 = vmul.f32 %v85_v12, %v394_v25 }
  0xf4   :  { %v469_v14 = vadd.f32 1e-07, %v109_v11 }
  0xf5   :  { %v115_v15 = vadd.f32 1e-07, %v107_v13 }
  0xf6   :  { %310 = vrsqrt.f32 %v469_v14  ;;  %vm149_vm4 = vweird.f32 %v469_v14 }
  0xf7   :  { %312 = vrsqrt.f32 %v115_v15  ;;  %vm129_vm3 = vweird.f32 %v115_v15 }
  0xf9   :  { %v100_v16 = vpop.xlane.xlu1 %99 }
  0xfa   :  { %v112_v17 = vmul.f32 %v100_v16, %v394_v25  ;;  %v94_v18 = vpop.xlane.xlu2 %93  ;;  %v88_v19 = vpop.xlane.xlu0 %87 }
  0xfb   :  { %v110_v20 = vmul.f32 %v94_v18, %v394_v25  ;;  %v108_v21 = vmul.f32 %v88_v19, %v394_v25 }
  0xfc   :  { %v475_v22 = vpop.eup %310  ;;  %v477_v23 = vadd.f32 1e-07, %v112_v17 }
  0xfd   :  { %v313_v24 = vpop.eup %312  ;;  %v144_v26 = vmul.f32 %v475_v22, %v469_v14  ;;  %v481_v27 = vadd.f32 1e-07, %v110_v20  ;;  %v483_v28 = vadd.f32 1e-07, %v108_v21  ;;  %vm150_vm6 = vweird.f32 %v475_v22 }
  0xfe   :  { %v124_v29 = vmul.f32 %v313_v24, %v115_v15  ;;  %314 = vrsqrt.f32 %v477_v23  ;;  %vm130_vm2 = vweird.f32 %v313_v24  ;;  %vm179_vm7 = vweird.f32 %v477_v23  ;;  %vm527_vm12 = vmor %vm149_vm4, %vm150_vm6 }
  0xff   :  { %316 = vrsqrt.f32 %v481_v27  ;;  %v145_v30 = vmul.f32 %v475_v22, %v144_v26  ;;  %vm131_vm5 = vmor %vm129_vm3, %vm130_vm2  ;;  %vm159_vm9 = vweird.f32 %v481_v27  ;;  %vm139_vm15 = vweird.f32 %v483_v28 }
 0x100   :  { %v125_v33 = vmul.f32 %v313_v24, %v124_v29  ;;  %318 = vrsqrt.f32 %v483_v28 }
 0x101   :  { %v146_v40 = vmul.f32 0.5, %v145_v30 }
 0x102   :  { %v126_v34 = vmul.f32 0.5, %v125_v33  ;;  %v103_v35 = vpop.xlane.xlu2 %102  ;;  %v97_v36 = vpop.xlane.xlu0 %96 }
 0x103   :  { %v113_v37 = vmul.f32 %v103_v35, %v394_v25  ;;  %v111_v38 = vmul.f32 %v97_v36, %v394_v25  ;;  %v147_v56 = vsub.f32 1.5, %v146_v40 }
 0x104   :  { %v491_v39 = vpop.eup %314  ;;  %v127_v41 = vsub.f32 1.5, %v126_v34 }
 0x105   :  { %v317_v42 = vpop.eup %316  ;;  %v174_v45 = vmul.f32 %v491_v39, %v477_v23  ;;  %v495_v47 = vadd.f32 1e-07, %v113_v37  ;;  %v498_v51 = vadd.f32 1e-07, %v111_v38  ;;  %vm180_vm8 = vweird.f32 %v491_v39 }
 0x106   :  { %v319_v48 = vpop.eup %318  ;;  %v128_v49 = vmul.f32 %v313_v24, %v127_v41  ;;  %v154_v50 = vmul.f32 %v317_v42, %v481_v27  ;;  %v148_v7 = vmul.f32 %v475_v22, %v147_v56  ;;  %vm160_vm10 = vweird.f32 %v317_v42  ;;  %vm539_vm13 = vmor %vm179_vm7, %vm180_vm8 }
 0x107   :  { %v175_v54 = vmul.f32 %v491_v39, %v174_v45  ;;  %v134_v55 = vmul.f32 %v319_v48, %v483_v28  ;;  %320 = vrsqrt.f32 %v495_v47  ;;  %vm140_vm11 = vweird.f32 %v319_v48  ;;  %vm161_vm14 = vmor %vm159_vm9, %vm160_vm10 }
 0x108   :  { %v132_v57 = vsel %vm131_vm5, %v313_v24, %v128_v49  ;;  %v155_v59 = vmul.f32 %v317_v42, %v154_v50  ;;  %322 = vrsqrt.f32 %v498_v51  ;;  %vm141_vm1 = vmor %vm139_vm15, %vm140_vm11  ;;  %v152_v29 = vsel %vm527_vm12, %v475_v22, %v148_v7 }
 0x109   :  { %v203_v62 = vmul.f32 %v132_v57, %v400_v32  ;;  %v176_v63 = vmul.f32 0.5, %v175_v54  ;;  %v135_v0 = vmul.f32 %v319_v48, %v134_v55  ;;  %vm189_vm2 = vweird.f32 %v495_v47 }
 0x10a   :  { %v156_v1 = vmul.f32 0.5, %v155_v59  ;;  %v106_v2 = vpop.xlane.xlu0 %105  ;;  %v205_v37 = vmul.f32 %v152_v29, %v398_v31  ;;  %vm169_vm6 = vweird.f32 %v498_v51 }
 0x10b   :  { %v214_v3 = vmul.f32 %v504_v53, %v203_v62  ;;  %v177_v4 = vsub.f32 1.5, %v176_v63  ;;  %v136_v5 = vmul.f32 0.5, %v135_v0  ;;  %v114_v6 = vmul.f32 %v106_v2, %v394_v25  ;;  %v259_v25 = vpop.permute.xlu2 %258 }
 0x10c   :  { %v157_v10 = vsub.f32 1.5, %v156_v1  ;;  %v216_v59 = vmul.f32 %v504_v53, %v205_v37 }
 0x10d   :  { %v321_v32 = vpop.eup %320  ;;  %v225_v12 = vadd.f32 %v514_v61, %v214_v3  ;;  %v178_v13 = vmul.f32 %v491_v39, %v177_v4  ;;  %v137_v15 = vsub.f32 1.5, %v136_v5  ;;  %v533_v16 = vadd.f32 1e-07, %v114_v6 }
 0x10e   :  { %v323_v17 = vpop.eup %322  ;;  %v158_v14 = vmul.f32 %v317_v42, %v157_v10  ;;  %v184_v19 = vmul.f32 %v321_v32, %v495_v47  ;;  %vm190_vm3 = vweird.f32 %v321_v32  ;;  %v227_v2 = vadd.f32 %v514_v61, %v216_v59 }
 0x10f   :  { %v281_v20 = vmul.f32 %v463_v8, %v225_v12  ;;  %v138_v21 = vmul.f32 %v319_v48, %v137_v15  ;;  %v164_v24 = vmul.f32 %v323_v17, %v498_v51  ;;  %324 = vrsqrt.f32 %v533_v16  ;;  %vm191_vm5 = vmor %vm189_vm2, %vm190_vm3 }
 0x110   :  { %v185_v23 = vmul.f32 %v321_v32, %v184_v19  ;;  %v162_v26 = vsel %vm161_vm14, %v317_v42, %v158_v14  ;;  %v182_v30 = vsel %vm539_vm13, %v491_v39, %v178_v13  ;;  %vm170_vm4 = vweird.f32 %v323_v17 }
 0x111   :  { %289 = vst.msk [vmem:[%s622_s4] sm:$0xff] %vm27_vm0, %v281_v20  ;;  %v142_v8 = vsel %vm141_vm1, %v319_v48, %v138_v21  ;;  %v165_v27 = vmul.f32 %v323_v17, %v164_v24  ;;  %v206_v28 = vmul.f32 %v162_v26, %v413_v44  ;;  %v208_v35 = vmul.f32 %v182_v30, %v411_v43  ;;  %v264_v44 = vpop.permute.xlu1 %263  ;;  %vm171_vm7 = vmor %vm169_vm6, %vm170_vm4 }
 0x112   :  { %v204_v33 = vmul.f32 %v142_v8, %v416_v46  ;;  %v186_v34 = vmul.f32 0.5, %v185_v23  ;;  %vm199_vm9 = vweird.f32 %v533_v16 }
 0x113   :  { %v166_v22 = vmul.f32 0.5, %v165_v27  ;;  %v217_v36 = vmul.f32 %v504_v53, %v206_v28  ;;  %v219_v41 = vmul.f32 %v504_v53, %v208_v35  ;;  %v269_v54 = vpop.permute.xlu2 %268 }
 0x114   :  { %v215_v38 = vmul.f32 %v504_v53, %v204_v33  ;;  %v187_v40 = vsub.f32 1.5, %v186_v34 }
 0x115   :  { %v167_v39 = vsub.f32 1.5, %v166_v22  ;;  %v228_v46 = vadd.f32 %v514_v61, %v217_v36  ;;  %v325_v42 = vpop.eup %324  ;;  %v230_v48 = vadd.f32 %v514_v61, %v219_v41 }
 0x116   :  { %v226_v43 = vadd.f32 %v514_v61, %v215_v38  ;;  %v188_v45 = vmul.f32 %v321_v32, %v187_v40  ;;  %v194_v50 = vmul.f32 %v325_v42, %v533_v16  ;;  %vm200_vm8 = vweird.f32 %v325_v42 }
 0x117   :  { %v168_v31 = vmul.f32 %v323_v17, %v167_v39  ;;  %v284_v49 = vmul.f32 %v259_v25, %v228_v46  ;;  %v286_v56 = vmul.f32 %v269_v54, %v230_v48  ;;  %vm201_vm10 = vmor %vm199_vm9, %vm200_vm8 }
 0x118   :  { %v282_v55 = vmul.f32 %v465_v9, %v226_v43  ;;  %v192_v57 = vsel %vm191_vm5, %v321_v32, %v188_v45  ;;  %v195_v47 = vmul.f32 %v325_v42, %v194_v50 }
 0x119   :  { %292 = vst.msk [vmem:[%s622_s4 + $0x18] sm:$0xff] %vm27_vm0, %v284_v49  ;;  %v172_v62 = vsel %vm171_vm7, %v323_v17, %v168_v31  ;;  %v209_v51 = vmul.f32 %v192_v57, %v432_v58 }
 0x11a   :  { %290 = vst.msk [vmem:[%s622_s4 + $0x8] sm:$0xff] %vm27_vm0, %v282_v55  ;;  %v207_v9 = vmul.f32 %v172_v62, %v427_v52  ;;  %v196_v63 = vmul.f32 0.5, %v195_v47  ;;  %v274_v52 = vpop.permute.xlu1 %273 }
 0x11b   :  { %294 = vst.msk [vmem:[%s622_s4 + $0x28] sm:$0xff] %vm27_vm0, %v286_v56  ;;  %v220_v0 = vmul.f32 %v504_v53, %v209_v51  ;;  %v279_v25 = vpop.permute.xlu2 %278 }
 0x11c   :  { %v218_v1 = vmul.f32 %v504_v53, %v207_v9  ;;  %v197_v58 = vsub.f32 1.5, %v196_v63 }
 0x11d   :  { %v231_v3 = vadd.f32 %v514_v61, %v220_v0  ;;  %v254_v4 = vpop.permute.xlu0 %253 }
 0x11e   :  { %v229_v5 = vadd.f32 %v514_v61, %v218_v1  ;;  %v283_v6 = vmul.f32 %v254_v4, %v227_v2  ;;  %v198_v7 = vmul.f32 %v325_v42, %v197_v58 }
 0x11f   :  { %v287_v10 = vmul.f32 %v274_v52, %v231_v3 }
 0x120   :  { %v285_v32 = vmul.f32 %v264_v44, %v229_v5  ;;  %291 = vst.msk [vmem:[%s622_s4 + $0x10] sm:$0xff] %vm27_vm0, %v283_v6  ;;  %v202_v11 = vsel %vm201_vm10, %v325_v42, %v198_v7 }
 0x121   :  { %295 = vst.msk [vmem:[%s622_s4 + $0x30] sm:$0xff] %vm27_vm0, %v287_v10  ;;  %v210_v12 = vmul.f32 %v202_v11, %v436_v60 }
 0x122   :  { %293 = vst.msk [vmem:[%s622_s4 + $0x20] sm:$0xff] %vm27_vm0, %v285_v32 }
 0x123   :  { %v221_v13 = vmul.f32 %v504_v53, %v210_v12 }
 0x125   :  { %v232_v15 = vadd.f32 %v514_v61, %v221_v13 }
 0x127   :  { %v288_v16 = vmul.f32 %v279_v25, %v232_v15 }
 0x129   :  { %296 = vst.msk [vmem:[%s622_s4 + $0x38] sm:$0xff] %vm27_vm0, %v288_v16 }

</bundles_post_ra>
